<compile_context>
chip_gen: v5e
topology: v5e:2x2
jax: 0.10.0
libtpu: 0.0.40
codegen_flags: <defaults>
</compile_context>

<pallas_src>
import jax
import jax.numpy as jnp
from jax.experimental import pallas as pl
from jax.experimental.pallas import tpu as pltpu


def _sum_dim0_kernel(x_ref, o_ref, acc_ref):
    # x_ref: (tn, tm) input tile, o_ref: (1, tm) output tile,
    # acc_ref: (1, tm) float32 scratch accumulator.
    k = pl.program_id(1)  # reduction-axis (N) grid position (last grid axis)

    @pl.when(k == 0)
    def _():
        acc_ref[...] = jnp.zeros_like(acc_ref)

    # Accumulate in float32 regardless of input dtype. This kernel is
    # HBM-bandwidth bound (each element read once, one add), so the extra
    # VPU work is free filler.
    acc_ref[...] += jnp.sum(x_ref[...], axis=0, dtype=jnp.float32,
                            keepdims=True)

    @pl.when(k == pl.num_programs(1) - 1)
    def _():
        o_ref[...] = acc_ref[...].astype(o_ref.dtype)


def _round_up(v: int, k: int) -> int:
    return ((v + k - 1) // k) * k


def sum_pooling(x: jax.Array,
                *,
                max_tile_m: int = 2048,
                max_tile_n: int = 512,
                vmem_tile_budget_bytes: int = 12 * 1024 * 1024) -> jax.Array:
    """Equivalent of torch.sum(x, dim=0)."""
    n = x.shape[0]
    rest_shape = x.shape[1:]
    m = 1
    for d in rest_shape:
        m *= d

    x2 = x.reshape(n, m)
    itemsize = jnp.dtype(x.dtype).itemsize

    # ---- lane (M) tile: big, multiple of 128 ----
    m128 = _round_up(m, 128)
    tm = min(max_tile_m, m128)
    # Give the parallel axis >= 2 grid steps when M allows it, so megacore
    # (v7x: 2 TCs) can shard it.
    if m128 // tm < 2 and m128 >= 256:
        tm = _round_up((m128 + 1) // 2, 128)
    m_pad = _round_up(m128, tm)
    grid_m = m_pad // tm

    # ---- sublane (N / reduction) tile: keep 2 * tn * tm * bytes in budget ----
    n8 = _round_up(n, 8)
    tn_budget = max(8, vmem_tile_budget_bytes // (2 * tm * itemsize))
    tn = min(max_tile_n, n8, tn_budget)
    tn = max(8, (tn // 8) * 8)
    n_pad = _round_up(n8, tn)
    grid_n = n_pad // tn

    # ---- pad once in the wrapper. Padded rows are zeros (sum-neutral along
    # axis 0); padded lane columns are sliced off after the call. ----
    if (n_pad, m_pad) != (n, m):
        x2 = jnp.pad(x2, ((0, n_pad - n), (0, m_pad - m)))

    out2 = pl.pallas_call(
        _sum_dim0_kernel,
        out_shape=jax.ShapeDtypeStruct((1, m_pad), x.dtype),
        grid_spec=pltpu.PrefetchScalarGridSpec(
            num_scalar_prefetch=0,
            grid=(grid_m, grid_n),  # reduction axis last
            in_specs=[pl.BlockSpec((tn, tm), lambda i, k: (k, i))],
            out_specs=pl.BlockSpec((1, tm), lambda i, k: (0, i)),
            scratch_shapes=[pltpu.VMEM((1, tm), jnp.float32)],
        ),
        compiler_params=pltpu.CompilerParams(
            dimension_semantics=("parallel", "arbitrary"),
            vmem_limit_bytes=32 * 1024 * 1024,
        ),
    )(x2)

    return out2[0, :m].reshape(rest_shape)


if __name__ == "__main__":
    key = jax.random.PRNGKey(0)

    # Primary check: float32, shapes consistent with the module's forward.
    x = jax.random.normal(key, (2, 4, 16, 16), dtype=jnp.float32)
    out = sum_pooling(x)
    jax.block_until_ready(out)
    ref = jnp.sum(x, axis=0)
    assert out.shape == ref.shape == (4, 16, 16)
    assert jnp.allclose(out, ref, atol=1e-6), "f32 mismatch vs reference"

    # Secondary check: bf16 input with N > sublane tile, exercises N-padding
    # and the float32 accumulator path.
    xb = jax.random.normal(jax.random.PRNGKey(1), (20, 4, 16, 16),
                           dtype=jnp.bfloat16)
    outb = sum_pooling(xb)
    jax.block_until_ready(outb)
    refb = jnp.sum(xb.astype(jnp.float32), axis=0)
    assert jnp.allclose(outb.astype(jnp.float32), refb, atol=0.125, rtol=0.05), \
        "bf16 mismatch vs f32 reference"

    print("KERNEL_OK")
</pallas_src>

<mosaic_0001>
module attributes {stable_mosaic.version = 11 : i64} {
  func.func @_sum_dim0_kernel(%arg0: i32, %arg1: i32, %arg2: memref<8x512xf32, #tpu.memory_space<vmem>>, %arg3: memref<1x512xf32, #tpu.memory_space<vmem>>, %arg4: memref<1x512xf32, #tpu.memory_space<vmem>>) attributes {dimension_semantics = [#tpu.dimension_semantics<parallel>, #tpu.dimension_semantics<arbitrary>], iteration_bounds = array<i64: 2, 1>, scalar_prefetch = 0 : i64, scratch_operands = 1 : i64, tpu.core_type = #tpu.core_type<tc>, window_params = [{transform_indices = @transform_0, window_bounds = array<i64: 8, 512>}, {transform_indices = @transform_1, window_bounds = array<i64: 1, 512>}]} {
    %c0_i32 = arith.constant 0 : i32
    %0 = arith.cmpi eq, %arg1, %c0_i32 : i32
    %1 = arith.extui %0 : i1 to i32
    %c0_i32_0 = arith.constant 0 : i32
    %2 = arith.cmpi ne, %1, %c0_i32_0 : i32
    scf.if %2 {
      %cst_8 = arith.constant 0.000000e+00 : f32
      %12 = vector.broadcast %cst_8 : f32 to vector<1x512xf32>
      %c0_9 = arith.constant 0 : index
      %c0_10 = arith.constant 0 : index
      %13 = vector.load %arg4[%c0_9, %c0_10] : memref<1x512xf32, #tpu.memory_space<vmem>>, vector<1x512xf32>
      tpu.vector_store %arg4[%c0_9, %c0_10], %12 {strides = array<i32>} : memref<1x512xf32, #tpu.memory_space<vmem>>, vector<1x512xf32>,
    } else {
    }
    %c0 = arith.constant 0 : index
    %c0_1 = arith.constant 0 : index
    %3 = vector.load %arg4[%c0, %c0_1] : memref<1x512xf32, #tpu.memory_space<vmem>>, vector<1x512xf32>
    %c0_2 = arith.constant 0 : index
    %c0_3 = arith.constant 0 : index
    %4 = vector.load %arg2[%c0_2, %c0_3] : memref<8x512xf32, #tpu.memory_space<vmem>>, vector<8x512xf32>
    %cst = arith.constant dense<0.000000e+00> : vector<512xf32>
    %5 = vector.multi_reduction <add>, %4, %cst [0] : vector<8x512xf32> to vector<512xf32>
    %6 = vector.shape_cast %5 : vector<512xf32> to vector<1x512xf32>
    %7 = arith.addf %3, %6 : vector<1x512xf32>
    %c0_4 = arith.constant 0 : index
    %c0_5 = arith.constant 0 : index
    %8 = vector.load %arg4[%c0_4, %c0_5] : memref<1x512xf32, #tpu.memory_space<vmem>>, vector<1x512xf32>
    tpu.vector_store %arg4[%c0_4, %c0_5], %7 {strides = array<i32>} : memref<1x512xf32, #tpu.memory_space<vmem>>, vector<1x512xf32>,
    %c0_i32_6 = arith.constant 0 : i32
    %9 = arith.cmpi eq, %arg1, %c0_i32_6 : i32
    %10 = arith.extui %9 : i1 to i32
    %c0_i32_7 = arith.constant 0 : i32
    %11 = arith.cmpi ne, %10, %c0_i32_7 : i32
    scf.if %11 {
      %c0_8 = arith.constant 0 : index
      %c0_9 = arith.constant 0 : index
      %12 = vector.load %arg4[%c0_8, %c0_9] : memref<1x512xf32, #tpu.memory_space<vmem>>, vector<1x512xf32>
      %c0_10 = arith.constant 0 : index
      %c0_11 = arith.constant 0 : index
      %13 = vector.load %arg3[%c0_10, %c0_11] : memref<1x512xf32, #tpu.memory_space<vmem>>, vector<1x512xf32>
      tpu.vector_store %arg3[%c0_10, %c0_11], %12 {strides = array<i32>} : memref<1x512xf32, #tpu.memory_space<vmem>>, vector<1x512xf32>,
    } else {
    }
    return
  }
  func.func @transform_0(%arg0: i32, %arg1: i32) -> (i32, i32) {
    %c0_i32 = arith.constant 0 : i32
    return %arg1, %arg0 : i32, i32
  }
  func.func @transform_1(%arg0: i32, %arg1: i32) -> (i32, i32) {
    %c0_i32 = arith.constant 0 : i32
    %c0_i32_0 = arith.constant 0 : i32
    return %c0_i32, %arg0 : i32, i32
  }
}

</mosaic_0001>

<bundles_post_ra>
// kernel: tpu_custom_call.1
= control target key start
LH: loop header
LB: loop body
LE: loop exit
PB: predicated region body
PF: predicated region fallthrough
CT: control target
= control target key end

     0   :  { %6 = vsyncpa [#allocation4], 0  ;;  %s647_s0 = inlined_call_operand.hbm [shape: f32[8,1024], index: 0, kind: input, shape index: {}]   ;;  %s648_s1 = inlined_call_operand.hbm [shape: f32[1,1024], index: 1, kind: output, shape index: {}]  }
   0x1   :  { %8 = vsyncpa [#allocation4 + $0x1], 0 }
   0x2   :  { %9 = vsyncpa [#allocation5], 0 }
   0x3   :  { %11 = vsyncpa [#allocation5 + $0x1], 0  ;;  %s516_s6 = smov 0   ;;  %s518_s7 = smov 0  }
   0x4   :  { %s520_s8 = smov 0   ;;  %s522_s9 = smov 0  }
   0x5   :  { %s524_s10 = smov 0   ;;  %s526_s11 = smov 0  }
   0x6 LB: > { %s313_s12 = sadd.s32 4294967295, %s503_s11   ;;  %s314_s13 = sadd.s32 4294967294, %s503_s11   ;;  %s503_s11 = sphi %s526_s11, %s17_s11   ;;  %s499_s10 = sphi %s524_s10, %s659_s10   ;;  %s495_s9 = sphi %s522_s9, %s658_s9   ;;  %s491_s8 = sphi %s520_s8, %s657_s8   ;;  %s487_s7 = sphi %s518_s7, %s656_s7   ;;  %s483_s6 = sphi %s516_s6, %s655_s6  }
   0x7   : > { %s29_s14 = sadd.s32 1, %s499_s10  ;;  %s38_s15 = sadd.s32 1, %s491_s8 }
   0x8   : > { %p31_p0 = scmp.ge.s32.totalorder %s29_s14, 2  ;;  %p45_p1 = scmp.ne.s32.totalorder %s491_s8, %s487_s7 }
   0x9   : > { %p46_p2 = scmp.eq.s32.totalorder %s503_s11, 0  ;;  %p51_p3 = scmp.ne.s32.totalorder %s487_s7, %s483_s6 }
   0xa   : > { %s661_s14 = smov (%p31_p0, %s29_s14), 0  ;;  %p52_p5 = scmp.eq.s32.totalorder %s313_s12, 0 }
   0xb   : > { %p557_p4 = por %p46_p2, %p45_p1  ;;  %s34_s17 = ssub.s32 %s499_s10, %s661_s14 }
   0xc   : > { %p75_p6 = scmp.eq.s32.totalorder %s313_s12, 1  ;;  %p36_p7 = scmp.eq.s32.totalorder %s34_s17, 0 }
   0xd   : > { %p563_p8 = por %p52_p5, %p51_p3  ;;  %p81_p10 = scmp.eq.s32.totalorder %s314_s13, 1 }
   0xe   : > { %p567_p9 = por %p75_p6, %p45_p1  ;;  %p316_p12 = scmp.ge.s32.totalorder %s503_s11, 2 }
   0xf   : > { %s572_s20 = scalar_select %p36_p7, %s491_s8, %s38_s15  }
  0x10   : > { %p574_p11 = por %p81_p10, %p51_p3  ;;  %p340_p13 = scmp.lt.s32.totalorder %s503_s11, 2 }
  0x11   : > { %s101_s22 = sand.u32 1, %s491_s8   ;;  %s327_s24 = sshll.u32 %s499_s10, 5 }
  0x12   : > { %s317_s23 = sshll.u32 %s101_s22, 5  ;;  %s112_s27 = scalar_lea.hbm %s647_s0, %s327_s24 }
  0x13   : > { %s105_s28 = scalar_lea.vmem [#allocation3], %s317_s23  ;;  %s114_s30 = sshll.u32 %s112_s27, 4  ;;  %s115_s30 = int_to_ptr.hbm [resolvable:$true] %s114_s30 }
  0x14   : > { %s116_s29 = sshll.u32 %s105_s28, 4  ;;  %p333_p0 = pnand %p340_p13, %p557_p4  ;;  %s117_s29 = int_to_ptr.vmem [resolvable:$true] %s116_s29 }
  0x15   : > { %p320_p1 = scmp.ge.s32.totalorder %s503_s11, 1  ;;  %p121_p2 = scmp.lt.s32.totalorder %s503_s11, 3 }
  0x16   : > { %s102_s2 = scalar_lea.sflag [#allocation4], %s101_s22 }
  0x17   : > { %335 = dma.hbm_to_vmem [thread:$0]  (!%p333_p0), %s115_s30, 512, %s117_s29, %s102_s2  }
  0x18   : > { %p122_p3 = pnand %p320_p1, %p121_p2 }
  0x19   : > { %s590_s3 = sand.u32 (!%p122_p3), 1, %s487_s7  }
  0x1a   : > { %125 = sbr.rel (%p122_p3) target bundleno = 63 (0x3f), region = 24  ;;  %s321_s4 = sshll.u32 (!%p122_p3), %s590_s3, 5 }
  0x1b   : > { %s128_s5 = scalar_lea.sflag (!%p122_p3), [#allocation4], %s590_s3  ;;  %s131_s12 = scalar_lea.vmem (!%p122_p3), [#allocation3], %s321_s4 }
  0x1f   : > { %474 = dma.done.wait (%p563_p8), %s128_s5, 512  }
  0x20   : > { %476 = vsyncadd (%p563_p8), %s128_s5, 4294966784  ;;  %v157_v0 = vlaneseq  ;;  %v505_v2 = vmov 0.0   ;;  %v163_v3 = vld [vmem:[%s131_s12] sm:$0xff]  ;;  %v164_v4 = vld [vmem:[%s131_s12 + $0x8] sm:$0xff]  ;;  %vm198_vm1 = vcmask 1040384   ;;  %vm200_vm2 = vcmask 1042434  }
  0x21   : > { %v165_v5 = vld [vmem:[%s131_s12 + $0x10] sm:$0xff]  ;;  %v166_v6 = vld [vmem:[%s131_s12 + $0x18] sm:$0xff]  ;;  %v167_v7 = vrot.slane %v163_v3, 4  ;;  %v173_v8 = vrot.slane %v164_v4, 4  ;;  %vm202_vm3 = vcmask 1041408   ;;  %s322_s13 = sshll.u32 %s590_s3, 2 }
  0x22   : > { %vm598_vm0 = vcmp.lt.s32.totalorder %v157_v0, 512  ;;  %v179_v9 = vrot.slane %v165_v5, 4  ;;  %v185_v10 = vrot.slane %v166_v6, 4  ;;  %s324_s15 = sshll.u32 %s495_s9, 2  ;;  %s150_s22 = scalar_lea.vmem [#allocation6], %s322_s13 }
  0x23   : > { %161 = vst.msk [vmem:[#allocation2] sm:$0xf] %vm598_vm0, %v505_v2  ;;  %v168_v11 = vadd.f32 %v167_v7, %v163_v3  ;;  %v174_v12 = vadd.f32 %v173_v8, %v164_v4  ;;  %s227_s18 = scalar_lea.hbm %s648_s1, %s324_s15  ;;  %s229_s23 = sshll.u32 %s150_s22, 4  ;;  %s230_s23 = int_to_ptr.vmem [resolvable:$true] %s229_s23 }
  0x24   : > { %v180_v13 = vadd.f32 %v179_v9, %v165_v5  ;;  %v186_v14 = vadd.f32 %v185_v10, %v166_v6  ;;  %s231_s24 = sshll.u32 %s227_s18, 4  ;;  %s217_s25 = scalar_lea.sflag [#allocation5], %s590_s3  ;;  %s232_s24 = int_to_ptr.hbm [resolvable:$true] %s231_s24 }
  0x25   : > { %v169_v15 = vrot.slane %v168_v11, 2  ;;  %v175_v16 = vrot.slane %v174_v12, 2  ;;  %s435_s9 = sshra.s32 %s232_s24, 4  ;;  %s441_s29 = scalar_lea.hbm %s648_s1, 8  ;;  %s436_s9 = int_to_ptr.hbm [resolvable:$true] %s435_s9 }
  0x26   : > { %v181_v17 = vrot.slane %v180_v13, 2  ;;  %v187_v18 = vrot.slane %v186_v14, 2  ;;  %s437_s26 = scalar_lea.hbm %s436_s9, 4  ;;  %p442_p7 = scmp.lt.s32.totalorder %s436_s9, %s648_s1 }
  0x27   : > { %v170_v19 = vadd.f32 %v169_v15, %v168_v11  ;;  %v176_v20 = vadd.f32 %v175_v16, %v174_v12  ;;  %p438_p4 = scmp.ne.s32.totalorder %s436_s9, %s437_s26  ;;  %p443_p8 = scmp.lt.s32.totalorder %s441_s29, %s437_s26 }
  0x28   : > { %v182_v21 = vadd.f32 %v181_v17, %v180_v13  ;;  %v188_v22 = vadd.f32 %v187_v18, %v186_v14 }
  0x29   : > { %v171_v23 = vrot.slane %v170_v19, 1  ;;  %v177_v24 = vrot.slane %v176_v20, 1  ;;  %p439_p5 = pnand %p438_p4, %p567_p9  ;;  %p444_p10 = por %p443_p8, %p442_p7 }
  0x2a   : > { %v183_v25 = vrot.slane %v182_v21, 1  ;;  %v189_v26 = vrot.slane %v188_v22, 1  ;;  %v162_v34 = vld [vmem:[#allocation2] sm:$0xf] }
  0x2b   : > { %v172_v27 = vadd.f32 %v171_v23, %v170_v19  ;;  %v178_v28 = vadd.f32 %v177_v24, %v176_v20  ;;  %p440_p6 = pneg %p439_p5 }
  0x2c   : > { %v184_v29 = vadd.f32 %v183_v25, %v182_v21  ;;  %v190_v30 = vadd.f32 %v189_v26, %v188_v22 }
  0x2d   : > { %v195_v31 = vrot.slane %v178_v28, 7  ;;  %p445_p13 = pnand %p444_p10, %p440_p6 }
  0x2e   : > { %v196_v32 = vrot.slane %v184_v29, 6  ;;  %v197_v33 = vrot.slane %v190_v30, 5 }
  0x2f   : > { %v199_v35 = vsel %vm198_vm1, %v172_v27, %v195_v31 }
  0x30   : > { %v201_v36 = vsel %vm200_vm2, %v196_v32, %v197_v33 }
  0x31   : > { %v203_v37 = vsel %vm202_vm3, %v199_v35, %v201_v36 }
  0x32   : > { %v205_v38 = vadd.f32 %v203_v37, %v162_v34 }
  0x34   : > { %210 = vst.msk [vmem:[#allocation2] sm:$0xf] %vm598_vm0, %v205_v38 }
  0x3b   : > { %v214_v39 = vld [vmem:[#allocation2] sm:$0xf] }
  0x3c   : > { %215 = vst.msk [vmem:[%s150_s22] sm:$0xf] %vm598_vm0, %v214_v39 }
  0x3d   : > { %448 = shalt.err (!%p445_p13)
}
  0x3e   : > { %330 = dma.vmem_to_hbm [thread:$0]  (%p567_p9), %s230_s23, 64, %s232_s24, %s217_s25  }
  0x3f PF: > { %s243_s3 = sand.u32 1, %s483_s6   ;;  %p337_p0 = pnand %p316_p12, %p574_p11 }
  0x40   : > { %s244_s4 = scalar_lea.sflag [#allocation5], %s243_s3 }
  0x41   : > { %p338_p1 = pneg %p337_p0 }
  0x43   : > { %478 = dma.done.wait (%p338_p1), %s244_s4, 64  }
  0x44   : > { %480 = vsyncadd (%p338_p1), %s244_s4, 4294967232  ;;  %s17_s11 = sadd.s32 1, %s503_s11   ;;  %s655_s6 = smov %s487_s7 }
  0x45   : > { %p14_p2 = scmp.ge.s32.totalorder %s17_s11, 4   ;;  %s656_s7 = smov %s491_s8 }
  0x46   : > { %s657_s8 = smov %s572_s20  ;;  %s658_s9 = smov %s499_s10 }
  0x47   : > { %s659_s10 = smov %s661_s14  ;;  %16 = sbr.rel (!%p14_p2) target bundleno = 6 (0x6), region = 77 }
  0x4c   :  { %250 = vsyncpa [#allocation4], 1 }
  0x4d   :  { %252 = vsyncpa [#allocation4 + $0x1], 1 }
  0x4e   :  { %253 = vsyncpa [#allocation5], 1 }
  0x4f   :  { %255 = vsyncpa [#allocation5 + $0x1], 1 }

</bundles_post_ra>
